<compile_context>
chip_gen: v5e
topology: v5e:2x2
jax: 0.10.0
libtpu: 0.0.40
codegen_flags: <defaults>
</compile_context>

<pallas_src>
import jax
import jax.numpy as jnp
from jax import lax
from jax.experimental import pallas as pl
from jax.experimental.pallas import tpu as pltpu


def _gram_kernel(x_ref, o_ref):
    # x_ref: (BT, Rp, K) block; o_ref: (BT, Rp, Rp)
    xb = x_ref[...]
    # Batched Gram: contract K (axis 2) against K (axis 2), batch over axis 0.
    # RHS is consumed in transposed orientation by the MXU natively — no
    # explicit transpose materialized in VMEM.
    o_ref[...] = lax.dot_general(
        xb, xb,
        dimension_numbers=(((2,), (2,)), ((0,), (0,))),
        preferred_element_type=jnp.float32,
    )


def _choose_batch_tile(B: int, Rp: int, K: int, budget_bytes: int = 4 << 20) -> int:
    """Largest divisor of B whose double-buffered block fits the budget,
    preferring a grid length >= 2 (keeps both v7x TensorCores busy)."""
    per_batch = (Rp * Rp + Rp * K) * 4          # f32 bytes per batch element
    fits = [d for d in range(1, B + 1)
            if B % d == 0 and 2 * d * per_batch <= budget_bytes]
    if not fits:
        return 1
    multi_step = [d for d in fits if B // d >= 2]
    return max(multi_step) if multi_step else max(fits)


def embed2graph_by_product(x: jax.Array) -> jax.Array:
    """x: (B, R, K) float32  ->  (B, R, R, 1) float32."""
    x = x.astype(jnp.float32)
    B, R, K = x.shape

    # Pad roi dim to a multiple of 128 for lane-dense output stores.
    Rp = ((R + 127) // 128) * 128
    if Rp != R:
        x_p = jnp.pad(x, ((0, 0), (0, Rp - R), (0, 0)))
    else:
        x_p = x

    BT = _choose_batch_tile(B, Rp, K)
    grid = (B // BT,)

    out = pl.pallas_call(
        _gram_kernel,
        out_shape=jax.ShapeDtypeStruct((B, Rp, Rp), jnp.float32),
        grid_spec=pltpu.PrefetchScalarGridSpec(
            num_scalar_prefetch=0,
            grid=grid,
            in_specs=[
                # Full (Rp, K) slab per batch element, BT batch elems per step.
                pl.BlockSpec((BT, Rp, K), lambda b: (b, 0, 0)),
            ],
            out_specs=pl.BlockSpec((BT, Rp, Rp), lambda b: (b, 0, 0)),
        ),
        compiler_params=pltpu.CompilerParams(
            dimension_semantics=("parallel",),
        ),
    )(x_p)

    if Rp != R:
        out = out[:, :R, :R]

    # unsqueeze(-1): (B, R, R) -> (B, R, R, 1)  (glue, not hot-path)
    return out[..., None]


if __name__ == "__main__":
    # Module-consistent small shapes: batch=2, roi_num=264 (module default,
    # exercises the 128-padding path), input_dim=32.
    B, R, K = 2, 264, 32
    key = jax.random.PRNGKey(0)
    x = jax.random.normal(key, (B, R, K), dtype=jnp.float32)

    m = embed2graph_by_product(x)
    jax.block_until_ready(m)

    # Correctness check against plain-JAX reference (einsum 'ijk,ipk->ijp').
    ref = jnp.einsum("ijk,ipk->ijp", x, x)[..., None]
    assert m.shape == (B, R, R, 1), m.shape
    assert jnp.allclose(m, ref, atol=1e-4, rtol=1e-4)

    print("KERNEL_OK")
</pallas_src>

<mosaic_0001>
module attributes {stable_mosaic.version = 11 : i64} {
  func.func @_gram_kernel(%arg0: i32, %arg1: memref<1x384x32xf32, #tpu.memory_space<vmem>>, %arg2: memref<1x384x384xf32, #tpu.memory_space<vmem>>) attributes {dimension_semantics = [#tpu.dimension_semantics<parallel>], iteration_bounds = array<i64: 2>, scalar_prefetch = 0 : i64, scratch_operands = 0 : i64, tpu.core_type = #tpu.core_type<tc>, window_params = [{transform_indices = @transform_0, window_bounds = array<i64: 1, 384, 32>}, {transform_indices = @transform_1, window_bounds = array<i64: 1, 384, 384>}]} {
    %c0 = arith.constant 0 : index
    %c0_0 = arith.constant 0 : index
    %c0_1 = arith.constant 0 : index
    %0 = vector.load %arg1[%c0, %c0_0, %c0_1] : memref<1x384x32xf32, #tpu.memory_space<vmem>>, vector<1x384x32xf32>
    %cst = arith.constant dense<0.000000e+00> : vector<1x384x384xf32>
    %1 = tpu.matmul %0, %0, %cst {dimension_numbers = #tpu.dot_dimension_numbers<[2], [2], [1], [1], [0, 0, 0, 1, 1, 1], [0], [0]>} : vector<1x384x32xf32>, vector<1x384x32xf32>, vector<1x384x384xf32> -> vector<1x384x384xf32>
    %c0_2 = arith.constant 0 : index
    %c0_3 = arith.constant 0 : index
    %c0_4 = arith.constant 0 : index
    %2 = vector.load %arg2[%c0_2, %c0_3, %c0_4] : memref<1x384x384xf32, #tpu.memory_space<vmem>>, vector<1x384x384xf32>
    tpu.vector_store %arg2[%c0_2, %c0_3, %c0_4], %1 {strides = array<i32>} : memref<1x384x384xf32, #tpu.memory_space<vmem>>, vector<1x384x384xf32>,
    return
  }
  func.func @transform_0(%arg0: i32) -> (i32, i32, i32) {
    %c0_i32 = arith.constant 0 : i32
    %c0_i32_0 = arith.constant 0 : i32
    %c0_i32_1 = arith.constant 0 : i32
    return %arg0, %c0_i32, %c0_i32_0 : i32, i32, i32
  }
  func.func @transform_1(%arg0: i32) -> (i32, i32, i32) {
    %c0_i32 = arith.constant 0 : i32
    %c0_i32_0 = arith.constant 0 : i32
    %c0_i32_1 = arith.constant 0 : i32
    return %arg0, %c0_i32, %c0_i32_0 : i32, i32, i32
  }
}

</mosaic_0001>

<bundles_post_ra>
// kernel: tpu_custom_call.1
= control target key start
LH: loop header
LB: loop body
LE: loop exit
PB: predicated region body
PF: predicated region fallthrough
CT: control target
= control target key end

     0   :  { %6 = vsyncpa [#allocation3], 0  ;;  %s2215_s0 = inlined_call_operand.vmem [shape: f32[2,384,32], index: 0, kind: input, shape index: {}]   ;;  %s2216_s1 = inlined_call_operand.hbm [shape: f32[2,384,384], index: 1, kind: output, shape index: {}]  }
   0x1   :  { %8 = vsyncpa [#allocation3 + $0x1], 0  ;;  %s1381_s6 = smov 0   ;;  %s1383_s7 = smov 0  }
   0x2   :  { %s1385_s8 = smov 0   ;;  %s1387_s9 = smov 0  }
   0x3 LB: > { %s1402_s10 = sadd.s32 4294967295, %s1367_s9   ;;  %s1013_s11 = sadd.s32 4294967294, %s1367_s9   ;;  %s1367_s9 = sphi %s1387_s9, %s2222_s9   ;;  %s1363_s8 = sphi %s1385_s8, %s2221_s8   ;;  %s1359_s7 = sphi %s1383_s7, %s2220_s7   ;;  %s1355_s6 = sphi %s1381_s6, %s2219_s6  }
   0x4   : > { %s1406_s12 = sadd.s32 1, %s1367_s9   ;;  %s47_s13 = sadd.s32 1, %s1363_s8 }
   0x5   : > { %s44_s14 = ssub.s32 %s1367_s9, %s1406_s12  ;;  %p57_p0 = scmp.ne.s32.totalorder %s1363_s8, %s1359_s7 }
   0x6   : > { %p45_p1 = scmp.eq.s32.totalorder %s44_s14, 0  ;;  %p58_p2 = scmp.eq.s32.totalorder %s1402_s10, 1 }
   0x7   : > { %p63_p3 = scmp.ne.s32.totalorder %s1359_s7, %s1355_s6  ;;  %p64_p4 = scmp.eq.s32.totalorder %s1013_s11, 1 }
   0x8   : > { %s1417_s15 = scalar_select %p45_p1, %s1363_s8, %s47_s13  }
   0x9   : > { %p1419_p5 = por %p58_p2, %p57_p0  ;;  %p1423_p6 = por %p64_p4, %p63_p3 }
   0xa   : > { %p1016_p7 = scmp.ge.s32.totalorder %s1367_s9, 1  ;;  %p90_p8 = scmp.lt.s32.totalorder %s1367_s9, 3 }
   0xc   : > { %p91_p9 = pnand %p1016_p7, %p90_p8 }
   0xd   : > { %p110_p10 = scmp.lt.s32.totalorder (!%p91_p9), %s1402_s10, 1  ;;  %s107_s23 = sand.u32 (!%p91_p9), 1, %s1359_s7  }
   0xe   : > { %94 = sbr.rel (%p91_p9) target bundleno = 505 (0x1f9), region = 24  ;;  %s936_s3 = scalar_lea.sflag (!%p91_p9), [#allocation3], %s107_s23 }
   0xf   : > { %s1261_s24 = smul.u32 (!%p91_p9), 1152, %s107_s23  ;;  %s1325_s13 = scalar_lea.hbm (!%p91_p9), %s2216_s1, 2304 }
  0x10   : > { %s1263_s26 = smul.u32 (!%p91_p9), 1152, %s1402_s10 }
  0x11   : > { %s1875_s25 = scalar_lea.vmem (!%p91_p9), [#allocation2], %s1261_s24 }
  0x12   : > { %s947_s29 = scalar_lea.hbm (!%p91_p9), %s2216_s1, %s1263_s26  ;;  %s948_s30 = sshll.u32 (!%p91_p9), %s1875_s25, 4  ;;  %s949_s30 = int_to_ptr.vmem [resolvable:$true] %s948_s30 }
  0x13   : > { %s111_s18 = scalar_select %p110_p10, %s1402_s10, 1  ;;  %vm163_vm0 = vcmask 261120  }
  0x14   : > { %s950_s2 = sshll.u32 %s947_s29, 4  ;;  %s951_s2 = int_to_ptr.hbm [resolvable:$true] %s950_s2 }
  0x15   : > { %s1262_s19 = smul.u32 384, %s111_s18  ;;  %s1319_s4 = sshra.s32 %s951_s2, 4  ;;  %s1320_s4 = int_to_ptr.hbm [resolvable:$true] %s1319_s4 }
  0x16   : > { %s1321_s5 = scalar_lea.hbm %s1320_s4, 1152  ;;  %p1326_p0 = scmp.lt.s32.totalorder %s1320_s4, %s2216_s1 }
  0x17   : > { %s1434_s22 = scalar_lea.vmem %s2215_s0, %s1262_s19  ;;  %p1322_p11 = scmp.ne.s32.totalorder %s1320_s4, %s1321_s5 }
  0x18   : > { %v1437_v0 = vld [vmem:[%s1434_s22 + $0x78] sm:$0xff]  ;;  %v1450_v3 = vld [vmem:[%s1434_s22 + $0x70] sm:$0xff]  ;;  %v1467_v6 = vld [vmem:[%s1434_s22 + $0x68] sm:$0xff]  ;;  %p1327_p1 = scmp.lt.s32.totalorder %s1325_s13, %s1321_s5 }
  0x19   : > { %v1440_v1 = vld [vmem:[%s1434_s22 + $0x178] sm:$0xff]  ;;  %1213 = vmatpush.xpose.msk.msra.mxu3 %vm163_vm0, %v1437_v0  ;;  %v1453_v4 = vld [vmem:[%s1434_s22 + $0x170] sm:$0xff]  ;;  %1018 = vmatpush.xpose.msk.msra.mxu0 %vm163_vm0, %v1437_v0  ;;  %v1470_v7 = vld [vmem:[%s1434_s22 + $0x168] sm:$0xff]  ;;  %p1323_p12 = pnand %p1322_p11, %p1419_p5 }
  0x1a   : > { %1146 = vmatpush.xpose.msk.msra.mxu2 %vm163_vm0, %v1440_v1  ;;  %v1447_v2 = vld [vmem:[%s1434_s22 + $0xf8] sm:$0xff]  ;;  %v1460_v5 = vld [vmem:[%s1434_s22 + $0xf0] sm:$0xff]  ;;  %v1477_v8 = vld [vmem:[%s1434_s22 + $0xe8] sm:$0xff]  ;;  %p1328_p2 = por %p1327_p1, %p1326_p0 }
  0x1b   : > { %1082 = vmatpush.xpose.msk.msra.mxu1 %vm163_vm0, %v1447_v2  ;;  %v1484_v9 = vld [vmem:[%s1434_s22 + $0x60] sm:$0xff]  ;;  %v1501_v12 = vld [vmem:[%s1434_s22 + $0x58] sm:$0xff]  ;;  %v1518_v15 = vld [vmem:[%s1434_s22 + $0x50] sm:$0xff]  ;;  %p1324_p13 = pneg %p1323_p12 }
  0x1c   : > { %v1487_v10 = vld [vmem:[%s1434_s22 + $0x160] sm:$0xff]  ;;  %v1504_v13 = vld [vmem:[%s1434_s22 + $0x158] sm:$0xff]  ;;  %v1521_v16 = vld [vmem:[%s1434_s22 + $0x150] sm:$0xff] }
  0x1d   : > { %1214 = vmatpush.xpose.msk.msra.mxu3 %vm163_vm0, %v1450_v3  ;;  %1019 = vmatpush.xpose.msk.msra.mxu0 %vm163_vm0, %v1450_v3  ;;  %v1494_v11 = vld [vmem:[%s1434_s22 + $0xe0] sm:$0xff]  ;;  %v1511_v14 = vld [vmem:[%s1434_s22 + $0xd8] sm:$0xff]  ;;  %v1528_v17 = vld [vmem:[%s1434_s22 + $0xd0] sm:$0xff]  ;;  %p1329_p3 = pnand %p1328_p2, %p1324_p13 }
  0x1e   : > { %1147 = vmatpush.xpose.msk.msra.mxu2 %vm163_vm0, %v1453_v4  ;;  %v1535_v18 = vld [vmem:[%s1434_s22 + $0x48] sm:$0xff]  ;;  %v1552_v21 = vld [vmem:[%s1434_s22 + $0x40] sm:$0xff]  ;;  %v1569_v24 = vld [vmem:[%s1434_s22 + $0x38] sm:$0xff] }
  0x1f   : > { %1083 = vmatpush.xpose.msk.msra.mxu1 %vm163_vm0, %v1460_v5  ;;  %v1538_v19 = vld [vmem:[%s1434_s22 + $0x148] sm:$0xff]  ;;  %v1555_v22 = vld [vmem:[%s1434_s22 + $0x140] sm:$0xff]  ;;  %v1572_v25 = vld [vmem:[%s1434_s22 + $0x138] sm:$0xff] }
  0x20   : > { %v1545_v20 = vld [vmem:[%s1434_s22 + $0xc8] sm:$0xff]  ;;  %v1562_v23 = vld [vmem:[%s1434_s22 + $0xc0] sm:$0xff]  ;;  %v1579_v26 = vld [vmem:[%s1434_s22 + $0xb8] sm:$0xff] }
  0x21   : > { %1215 = vmatpush.xpose.msk.msra.mxu3 %vm163_vm0, %v1467_v6  ;;  %1020 = vmatpush.xpose.msk.msra.mxu0 %vm163_vm0, %v1467_v6  ;;  %v1586_v27 = vld [vmem:[%s1434_s22 + $0x30] sm:$0xff]  ;;  %v1603_v30 = vld [vmem:[%s1434_s22 + $0x28] sm:$0xff]  ;;  %v1620_v33 = vld [vmem:[%s1434_s22 + $0x20] sm:$0xff] }
  0x22   : > { %1148 = vmatpush.xpose.msk.msra.mxu2 %vm163_vm0, %v1470_v7  ;;  %v1589_v28 = vld [vmem:[%s1434_s22 + $0x130] sm:$0xff]  ;;  %v1606_v31 = vld [vmem:[%s1434_s22 + $0x128] sm:$0xff]  ;;  %v1623_v34 = vld [vmem:[%s1434_s22 + $0x120] sm:$0xff] }
  0x23   : > { %1084 = vmatpush.xpose.msk.msra.mxu1 %vm163_vm0, %v1477_v8  ;;  %v1596_v29 = vld [vmem:[%s1434_s22 + $0xb0] sm:$0xff]  ;;  %v1613_v32 = vld [vmem:[%s1434_s22 + $0xa8] sm:$0xff]  ;;  %v1630_v35 = vld [vmem:[%s1434_s22 + $0xa0] sm:$0xff] }
  0x24   : > { %v118_v36 = vld [vmem:[%s1434_s22 + $0x18] sm:$0xff]  ;;  %v117_v39 = vld [vmem:[%s1434_s22 + $0x10] sm:$0xff]  ;;  %v116_v42 = vld [vmem:[%s1434_s22 + $0x8] sm:$0xff] }
  0x25   : > { %1216 = vmatpush.xpose.msk.msra.mxu3 %vm163_vm0, %v1484_v9  ;;  %1021 = vmatpush.xpose.msk.msra.mxu0 %vm163_vm0, %v1484_v9  ;;  %v1638_v37 = vld [vmem:[%s1434_s22 + $0x118] sm:$0xff]  ;;  %v1652_v40 = vld [vmem:[%s1434_s22 + $0x110] sm:$0xff]  ;;  %v1665_v43 = vld [vmem:[%s1434_s22 + $0x108] sm:$0xff] }
  0x26   : > { %1149 = vmatpush.xpose.msk.msra.mxu2 %vm163_vm0, %v1487_v10  ;;  %v1645_v38 = vld [vmem:[%s1434_s22 + $0x98] sm:$0xff]  ;;  %v1658_v41 = vld [vmem:[%s1434_s22 + $0x90] sm:$0xff]  ;;  %v1671_v44 = vld [vmem:[%s1434_s22 + $0x88] sm:$0xff] }
  0x27   : > { %1085 = vmatpush.xpose.msk.msra.mxu1 %vm163_vm0, %v1494_v11  ;;  %v115_v45 = vld [vmem:[%s1434_s22] sm:$0xff] }
  0x28   : > { %v1678_v46 = vld [vmem:[%s1434_s22 + $0x100] sm:$0xff] }
  0x29   : > { %1217 = vmatpush.xpose.msk.msra.mxu3 %vm163_vm0, %v1501_v12  ;;  %1022 = vmatpush.xpose.msk.msra.mxu0 %vm163_vm0, %v1501_v12  ;;  %v1684_v47 = vld [vmem:[%s1434_s22 + $0x80] sm:$0xff] }
  0x2a   : > { %1150 = vmatpush.xpose.msk.msra.mxu2 %vm163_vm0, %v1504_v13 }
  0x2b   : > { %1086 = vmatpush.xpose.msk.msra.mxu1 %vm163_vm0, %v1511_v14 }
  0x2d   : > { %1218 = vmatpush.xpose.msk.msra.mxu3 %vm163_vm0, %v1518_v15  ;;  %1023 = vmatpush.xpose.msk.msra.mxu0 %vm163_vm0, %v1518_v15 }
  0x2e   : > { %1151 = vmatpush.xpose.msk.msra.mxu2 %vm163_vm0, %v1521_v16 }
  0x2f   : > { %1087 = vmatpush.xpose.msk.msra.mxu1 %vm163_vm0, %v1528_v17 }
  0x31   : > { %1219 = vmatpush.xpose.msk.msra.mxu3 %vm163_vm0, %v1535_v18  ;;  %1024 = vmatpush.xpose.msk.msra.mxu0 %vm163_vm0, %v1535_v18 }
  0x32   : > { %1152 = vmatpush.xpose.msk.msra.mxu2 %vm163_vm0, %v1538_v19 }
  0x33   : > { %1088 = vmatpush.xpose.msk.msra.mxu1 %vm163_vm0, %v1545_v20 }
  0x35   : > { %1220 = vmatpush.xpose.msk.msra.mxu3 %vm163_vm0, %v1552_v21  ;;  %1025 = vmatpush.xpose.msk.msra.mxu0 %vm163_vm0, %v1552_v21 }
  0x36   : > { %1153 = vmatpush.xpose.msk.msra.mxu2 %vm163_vm0, %v1555_v22 }
  0x37   : > { %1089 = vmatpush.xpose.msk.msra.mxu1 %vm163_vm0, %v1562_v23 }
  0x39   : > { %1221 = vmatpush.xpose.msk.msra.mxu3 %vm163_vm0, %v1569_v24  ;;  %1026 = vmatpush.xpose.msk.msra.mxu0 %vm163_vm0, %v1569_v24 }
  0x3a   : > { %1154 = vmatpush.xpose.msk.msra.mxu2 %vm163_vm0, %v1572_v25 }
  0x3b   : > { %1090 = vmatpush.xpose.msk.msra.mxu1 %vm163_vm0, %v1579_v26 }
  0x3d   : > { %1222 = vmatpush.xpose.msk.msra.mxu3 %vm163_vm0, %v1586_v27  ;;  %1027 = vmatpush.xpose.msk.msra.mxu0 %vm163_vm0, %v1586_v27 }
  0x3e   : > { %1155 = vmatpush.xpose.msk.msra.mxu2 %vm163_vm0, %v1589_v28 }
  0x3f   : > { %1091 = vmatpush.xpose.msk.msra.mxu1 %vm163_vm0, %v1596_v29 }
  0x41   : > { %1223 = vmatpush.xpose.msk.msra.mxu3 %vm163_vm0, %v1603_v30  ;;  %1028 = vmatpush.xpose.msk.msra.mxu0 %vm163_vm0, %v1603_v30 }
  0x42   : > { %1156 = vmatpush.xpose.msk.msra.mxu2 %vm163_vm0, %v1606_v31 }
  0x43   : > { %1092 = vmatpush.xpose.msk.msra.mxu1 %vm163_vm0, %v1613_v32 }
  0x45   : > { %1224 = vmatpush.xpose.msk.msra.mxu3 %vm163_vm0, %v1620_v33  ;;  %1029 = vmatpush.xpose.msk.msra.mxu0 %vm163_vm0, %v1620_v33 }
  0x46   : > { %1157 = vmatpush.xpose.msk.msra.mxu2 %vm163_vm0, %v1623_v34 }
  0x47   : > { %1093 = vmatpush.xpose.msk.msra.mxu1 %vm163_vm0, %v1630_v35 }
  0x49   : > { %1225 = vmatpush.xpose.msk.msra.mxu3 %vm163_vm0, %v118_v36  ;;  %1030 = vmatpush.xpose.msk.msra.mxu0 %vm163_vm0, %v118_v36 }
  0x4a   : > { %1158 = vmatpush.xpose.msk.msra.mxu2 %vm163_vm0, %v1638_v37 }
  0x4b   : > { %1094 = vmatpush.xpose.msk.msra.mxu1 %vm163_vm0, %v1645_v38 }
  0x4d   : > { %1226 = vmatpush.xpose.msk.msra.mxu3 %vm163_vm0, %v117_v39  ;;  %1031 = vmatpush.xpose.msk.msra.mxu0 %vm163_vm0, %v117_v39 }
  0x4e   : > { %1159 = vmatpush.xpose.msk.msra.mxu2 %vm163_vm0, %v1652_v40 }
  0x4f   : > { %1095 = vmatpush.xpose.msk.msra.mxu1 %vm163_vm0, %v1658_v41 }
  0x51   : > { %1227 = vmatpush.xpose.msk.msra.mxu3 %vm163_vm0, %v116_v42  ;;  %1032 = vmatpush.xpose.msk.msra.mxu0 %vm163_vm0, %v116_v42 }
  0x52   : > { %1160 = vmatpush.xpose.msk.msra.mxu2 %vm163_vm0, %v1665_v43 }
  0x53   : > { %1096 = vmatpush.xpose.msk.msra.mxu1 %vm163_vm0, %v1671_v44 }
  0x55   : > { %1228 = vmatpush.xpose.msk.msra.mxu3 %vm163_vm0, %v115_v45  ;;  %1033 = vmatpush.xpose.msk.msra.mxu0 %vm163_vm0, %v115_v45 }
  0x56   : > { %1161 = vmatpush.xpose.msk.msra.mxu2 %vm163_vm0, %v1678_v46 }
  0x57   : > { %1097 = vmatpush.xpose.msk.msra.mxu1 %vm163_vm0, %v1684_v47 }
  0x58   : > { %1070 = vmatmul.msk.f32.vlgmr.msra.gmra.mxu3 %vm163_vm0, %v1623_v34  ;;  %1034 = vmatmul.msk.f32.vlgmr.msra.gmra.mxu0 %vm163_vm0, %v115_v45 }
  0x59   : > { %1229 = vmatpush.xpose.msk.msrb.mxu3 %vm163_vm0, %v1447_v2  ;;  %1162 = vmatmul.msk.f32.vlgmr.msra.gmra.mxu2 %vm163_vm0, %v115_v45 }
  0x5a   : > { %1098 = vmatmul.msk.f32.vlgmr.msra.gmra.mxu1 %vm163_vm0, %v115_v45 }
  0x5d   : > { %1230 = vmatpush.xpose.msk.msrb.mxu3 %vm163_vm0, %v1460_v5 }
  0x60   : > { %1071 = vmatmul.msk.f32.gmra.mxu3 %vm163_vm0, %v1606_v31  ;;  %1035 = vmatmul.msk.f32.gmra.mxu0 %vm163_vm0, %v116_v42 }
  0x61   : > { %1231 = vmatpush.xpose.msk.msrb.mxu3 %vm163_vm0, %v1477_v8  ;;  %1163 = vmatmul.msk.f32.gmra.mxu2 %vm163_vm0, %v116_v42 }
  0x62   : > { %1099 = vmatmul.msk.f32.gmra.mxu1 %vm163_vm0, %v116_v42 }
  0x65   : > { %1232 = vmatpush.xpose.msk.msrb.mxu3 %vm163_vm0, %v1494_v11 }
  0x68   : > { %1072 = vmatmul.msk.f32.gmra.mxu3 %vm163_vm0, %v1589_v28  ;;  %1036 = vmatmul.msk.f32.gmra.mxu0 %vm163_vm0, %v117_v39 }
  0x69   : > { %1233 = vmatpush.xpose.msk.msrb.mxu3 %vm163_vm0, %v1511_v14  ;;  %1164 = vmatmul.msk.f32.gmra.mxu2 %vm163_vm0, %v117_v39 }
  0x6a   : > { %1100 = vmatmul.msk.f32.gmra.mxu1 %vm163_vm0, %v117_v39 }
  0x6d   : > { %1234 = vmatpush.xpose.msk.msrb.mxu3 %vm163_vm0, %v1528_v17 }
  0x70   : > { %1073 = vmatmul.msk.f32.gmra.mxu3 %vm163_vm0, %v1572_v25  ;;  %1037 = vmatmul.msk.f32.gmra.mxu0 %vm163_vm0, %v118_v36 }
  0x71   : > { %1235 = vmatpush.xpose.msk.msrb.mxu3 %vm163_vm0, %v1545_v20  ;;  %1165 = vmatmul.msk.f32.gmra.mxu2 %vm163_vm0, %v118_v36 }
  0x72   : > { %1101 = vmatmul.msk.f32.gmra.mxu1 %vm163_vm0, %v118_v36 }
  0x75   : > { %1236 = vmatpush.xpose.msk.msrb.mxu3 %vm163_vm0, %v1562_v23 }
  0x78   : > { %1074 = vmatmul.msk.f32.gmra.mxu3 %vm163_vm0, %v1555_v22  ;;  %1038 = vmatmul.msk.f32.gmra.mxu0 %vm163_vm0, %v1620_v33 }
  0x79   : > { %1237 = vmatpush.xpose.msk.msrb.mxu3 %vm163_vm0, %v1579_v26  ;;  %1166 = vmatmul.msk.f32.gmra.mxu2 %vm163_vm0, %v1620_v33 }
  0x7a   : > { %1102 = vmatmul.msk.f32.gmra.mxu1 %vm163_vm0, %v1620_v33 }
  0x7d   : > { %1238 = vmatpush.xpose.msk.msrb.mxu3 %vm163_vm0, %v1596_v29 }
  0x80   : > { %1075 = vmatmul.msk.f32.gmra.mxu3 %vm163_vm0, %v1538_v19  ;;  %1039 = vmatmul.msk.f32.gmra.mxu0 %vm163_vm0, %v1603_v30 }
  0x81   : > { %1239 = vmatpush.xpose.msk.msrb.mxu3 %vm163_vm0, %v1613_v32  ;;  %1167 = vmatmul.msk.f32.gmra.mxu2 %vm163_vm0, %v1603_v30 }
  0x82   : > { %1103 = vmatmul.msk.f32.gmra.mxu1 %vm163_vm0, %v1603_v30 }
  0x85   : > { %1240 = vmatpush.xpose.msk.msrb.mxu3 %vm163_vm0, %v1630_v35 }
  0x88   : > { %1076 = vmatmul.msk.f32.gmra.mxu3 %vm163_vm0, %v1521_v16  ;;  %1040 = vmatmul.msk.f32.gmra.mxu0 %vm163_vm0, %v1586_v27 }
  0x89   : > { %1241 = vmatpush.xpose.msk.msrb.mxu3 %vm163_vm0, %v1645_v38  ;;  %1168 = vmatmul.msk.f32.gmra.mxu2 %vm163_vm0, %v1586_v27 }
  0x8a   : > { %1104 = vmatmul.msk.f32.gmra.mxu1 %vm163_vm0, %v1586_v27 }
  0x8d   : > { %1242 = vmatpush.xpose.msk.msrb.mxu3 %vm163_vm0, %v1658_v41 }
  0x90   : > { %1077 = vmatmul.msk.f32.gmra.mxu3 %vm163_vm0, %v1504_v13  ;;  %1041 = vmatmul.msk.f32.gmra.mxu0 %vm163_vm0, %v1569_v24 }
  0x91   : > { %1243 = vmatpush.xpose.msk.msrb.mxu3 %vm163_vm0, %v1671_v44  ;;  %1169 = vmatmul.msk.f32.gmra.mxu2 %vm163_vm0, %v1569_v24 }
  0x92   : > { %1105 = vmatmul.msk.f32.gmra.mxu1 %vm163_vm0, %v1569_v24 }
  0x95   : > { %1244 = vmatpush.xpose.msk.msrb.mxu3 %vm163_vm0, %v1684_v47 }
  0x98   : > { %1078 = vmatmul.msk.f32.gmra.mxu3 %vm163_vm0, %v1487_v10  ;;  %1042 = vmatmul.msk.f32.gmra.mxu0 %vm163_vm0, %v1552_v21 }
  0x99   : > { %1245 = vmatpush.xpose.msk.msra.mxu3 %vm163_vm0, %v1440_v1  ;;  %1170 = vmatmul.msk.f32.gmra.mxu2 %vm163_vm0, %v1552_v21 }
  0x9a   : > { %1106 = vmatmul.msk.f32.gmra.mxu1 %vm163_vm0, %v1552_v21 }
  0x9d   : > { %1246 = vmatpush.xpose.msk.msra.mxu3 %vm163_vm0, %v1453_v4 }
  0xa0   : > { %1079 = vmatmul.msk.f32.gmra.mxu3 %vm163_vm0, %v1470_v7  ;;  %1043 = vmatmul.msk.f32.gmra.mxu0 %vm163_vm0, %v1535_v18 }
  0xa1   : > { %1247 = vmatpush.xpose.msk.msra.mxu3 %vm163_vm0, %v1470_v7  ;;  %1171 = vmatmul.msk.f32.gmra.mxu2 %vm163_vm0, %v1535_v18 }
  0xa2   : > { %1107 = vmatmul.msk.f32.gmra.mxu1 %vm163_vm0, %v1535_v18 }
  0xa5   : > { %1248 = vmatpush.xpose.msk.msra.mxu3 %vm163_vm0, %v1487_v10 }
  0xa8   : > { %1080 = vmatmul.msk.f32.gmra.mxu3 %vm163_vm0, %v1453_v4  ;;  %1044 = vmatmul.msk.f32.gmra.mxu0 %vm163_vm0, %v1518_v15 }
  0xa9   : > { %1249 = vmatpush.xpose.msk.msra.mxu3 %vm163_vm0, %v1504_v13  ;;  %1172 = vmatmul.msk.f32.gmra.mxu2 %vm163_vm0, %v1518_v15 }
  0xaa   : > { %1108 = vmatmul.msk.f32.gmra.mxu1 %vm163_vm0, %v1518_v15 }
  0xad   : > { %1250 = vmatpush.xpose.msk.msra.mxu3 %vm163_vm0, %v1521_v16 }
  0xb0   : > { %1081 = vmatmul.msk.f32.gmra.mxu3 %vm163_vm0, %v1440_v1  ;;  %1045 = vmatmul.msk.f32.gmra.mxu0 %vm163_vm0, %v1501_v12 }
  0xb1   : > { %1251 = vmatpush.xpose.msk.msra.mxu3 %vm163_vm0, %v1538_v19  ;;  %1173 = vmatmul.msk.f32.gmra.mxu2 %vm163_vm0, %v1501_v12 }
  0xb2   : > { %1109 = vmatmul.msk.f32.gmra.mxu1 %vm163_vm0, %v1501_v12 }
  0xb5   : > { %1252 = vmatpush.xpose.msk.msra.mxu3 %vm163_vm0, %v1555_v22 }
  0xb8   : > { %1134 = vmatmul.msk.f32.vlgmr.msrb.gmra.mxu3 %vm163_vm0, %v1623_v34  ;;  %1046 = vmatmul.msk.f32.gmra.mxu0 %vm163_vm0, %v1484_v9 }
  0xb9   : > { %1253 = vmatpush.xpose.msk.msra.mxu3 %vm163_vm0, %v1572_v25  ;;  %1174 = vmatmul.msk.f32.gmra.mxu2 %vm163_vm0, %v1484_v9 }
  0xba   : > { %1110 = vmatmul.msk.f32.gmra.mxu1 %vm163_vm0, %v1484_v9 }
  0xbd   : > { %1254 = vmatpush.xpose.msk.msra.mxu3 %vm163_vm0, %v1589_v28 }
  0xc0   : > { %1135 = vmatmul.msk.f32.gmra.mxu3 %vm163_vm0, %v1606_v31  ;;  %1047 = vmatmul.msk.f32.gmra.mxu0 %vm163_vm0, %v1467_v6 }
  0xc1   : > { %1255 = vmatpush.xpose.msk.msra.mxu3 %vm163_vm0, %v1606_v31  ;;  %1175 = vmatmul.msk.f32.gmra.mxu2 %vm163_vm0, %v1467_v6 }
  0xc2   : > { %1111 = vmatmul.msk.f32.gmra.mxu1 %vm163_vm0, %v1467_v6 }
  0xc5   : > { %1256 = vmatpush.xpose.msk.msra.mxu3 %vm163_vm0, %v1623_v34 }
  0xc8   : > { %1136 = vmatmul.msk.f32.gmra.mxu3 %vm163_vm0, %v1589_v28  ;;  %1048 = vmatmul.msk.f32.gmra.mxu0 %vm163_vm0, %v1450_v3 }
  0xc9   : > { %1257 = vmatpush.xpose.msk.msra.mxu3 %vm163_vm0, %v1638_v37  ;;  %1176 = vmatmul.msk.f32.gmra.mxu2 %vm163_vm0, %v1450_v3 }
  0xca   : > { %1112 = vmatmul.msk.f32.gmra.mxu1 %vm163_vm0, %v1450_v3 }
  0xcd   : > { %1258 = vmatpush.xpose.msk.msra.mxu3 %vm163_vm0, %v1652_v40 }
  0xd0   : > { %1137 = vmatmul.msk.f32.gmra.mxu3 %vm163_vm0, %v1572_v25  ;;  %1049 = vmatmul.msk.f32.gmra.mxu0 %vm163_vm0, %v1437_v0 }
  0xd1   : > { %1259 = vmatpush.xpose.msk.msra.mxu3 %vm163_vm0, %v1665_v43  ;;  %1177 = vmatmul.msk.f32.gmra.mxu2 %vm163_vm0, %v1437_v0 }
  0xd2   : > { %1113 = vmatmul.msk.f32.gmra.mxu1 %vm163_vm0, %v1437_v0 }
  0xd5   : > { %1260 = vmatpush.xpose.msk.msra.mxu3 %vm163_vm0, %v1678_v46  ;;  %v325_v48 = vpop.f32.mrf.mxu0 }
  0xd6   : > { %791 = vst [vmem:[%s1875_s25] sm:$0xff] %v325_v48 }
  0xd7   : > { %v486_v49 = vpop.f32.mrf.mxu1 }
  0xd8   : > { %1138 = vmatmul.msk.f32.gmra.mxu3 %vm163_vm0, %v1555_v22  ;;  %792 = vst [vmem:[%s1875_s25 + $0x8] sm:$0xff] %v486_v49  ;;  %1050 = vmatmul.msk.f32.gmra.mxu0 %vm163_vm0, %v1684_v47 }
  0xd9   : > { %1178 = vmatmul.msk.f32.gmra.mxu2 %vm163_vm0, %v1684_v47 }
  0xda   : > { %1114 = vmatmul.msk.f32.gmra.mxu1 %vm163_vm0, %v1684_v47 }
  0xdb   : > { %v433_v50 = vpop.f32.mrf.mxu3 }
  0xdc   : > { %v647_v51 = vpop.f32.mrf.mxu2  ;;  %899 = vst [vmem:[%s1875_s25 + $0x360] sm:$0xff] %v433_v50 }
  0xdd   : > { %793 = vst [vmem:[%s1875_s25 + $0x10] sm:$0xff] %v647_v51  ;;  %v328_v52 = vpop.f32.mrf.mxu0 }
  0xde   : > { %794 = vst [vmem:[%s1875_s25 + $0x18] sm:$0xff] %v328_v52 }
  0xdf   : > { %v489_v53 = vpop.f32.mrf.mxu1 }
  0xe0   : > { %1139 = vmatmul.msk.f32.gmra.mxu3 %vm163_vm0, %v1538_v19  ;;  %795 = vst [vmem:[%s1875_s25 + $0x20] sm:$0xff] %v489_v53  ;;  %1051 = vmatmul.msk.f32.gmra.mxu0 %vm163_vm0, %v1671_v44 }
  0xe1   : > { %1179 = vmatmul.msk.f32.gmra.mxu2 %vm163_vm0, %v1671_v44 }
  0xe2   : > { %1115 = vmatmul.msk.f32.gmra.mxu1 %vm163_vm0, %v1671_v44 }
  0xe3   : > { %v436_v54 = vpop.f32.mrf.mxu3 }
  0xe4   : > { %v650_v55 = vpop.f32.mrf.mxu2  ;;  %902 = vst [vmem:[%s1875_s25 + $0x378] sm:$0xff] %v436_v54 }
  0xe5   : > { %796 = vst [vmem:[%s1875_s25 + $0x28] sm:$0xff] %v650_v55  ;;  %v331_v56 = vpop.f32.mrf.mxu0 }
  0xe6   : > { %797 = vst [vmem:[%s1875_s25 + $0x30] sm:$0xff] %v331_v56 }
  0xe7   : > { %v492_v57 = vpop.f32.mrf.mxu1 }
  0xe8   : > { %1140 = vmatmul.msk.f32.gmra.mxu3 %vm163_vm0, %v1521_v16  ;;  %798 = vst [vmem:[%s1875_s25 + $0x38] sm:$0xff] %v492_v57  ;;  %1052 = vmatmul.msk.f32.gmra.mxu0 %vm163_vm0, %v1658_v41 }
  0xe9   : > { %1180 = vmatmul.msk.f32.gmra.mxu2 %vm163_vm0, %v1658_v41 }
  0xea   : > { %1116 = vmatmul.msk.f32.gmra.mxu1 %vm163_vm0, %v1658_v41 }
  0xeb   : > { %v439_v58 = vpop.f32.mrf.mxu3 }
  0xec   : > { %v653_v59 = vpop.f32.mrf.mxu2  ;;  %905 = vst [vmem:[%s1875_s25 + $0x390] sm:$0xff] %v439_v58 }
  0xed   : > { %799 = vst [vmem:[%s1875_s25 + $0x40] sm:$0xff] %v653_v59  ;;  %v334_v60 = vpop.f32.mrf.mxu0 }
  0xee   : > { %800 = vst [vmem:[%s1875_s25 + $0x48] sm:$0xff] %v334_v60 }
  0xef   : > { %v495_v61 = vpop.f32.mrf.mxu1 }
  0xf0   : > { %1141 = vmatmul.msk.f32.gmra.mxu3 %vm163_vm0, %v1504_v13  ;;  %801 = vst [vmem:[%s1875_s25 + $0x50] sm:$0xff] %v495_v61  ;;  %1053 = vmatmul.msk.f32.gmra.mxu0 %vm163_vm0, %v1645_v38 }
  0xf1   : > { %1181 = vmatmul.msk.f32.gmra.mxu2 %vm163_vm0, %v1645_v38 }
  0xf2   : > { %1117 = vmatmul.msk.f32.gmra.mxu1 %vm163_vm0, %v1645_v38 }
  0xf3   : > { %v442_v62 = vpop.f32.mrf.mxu3 }
  0xf4   : > { %v656_v63 = vpop.f32.mrf.mxu2  ;;  %908 = vst [vmem:[%s1875_s25 + $0x3a8] sm:$0xff] %v442_v62 }
  0xf5   : > { %802 = vst [vmem:[%s1875_s25 + $0x58] sm:$0xff] %v656_v63  ;;  %v337_v0 = vpop.f32.mrf.mxu0 }
  0xf6   : > { %803 = vst [vmem:[%s1875_s25 + $0x60] sm:$0xff] %v337_v0 }
  0xf7   : > { %v498_v3 = vpop.f32.mrf.mxu1 }
  0xf8   : > { %1142 = vmatmul.msk.f32.gmra.mxu3 %vm163_vm0, %v1487_v10  ;;  %804 = vst [vmem:[%s1875_s25 + $0x68] sm:$0xff] %v498_v3  ;;  %1054 = vmatmul.msk.f32.gmra.mxu0 %vm163_vm0, %v1630_v35 }
  0xf9   : > { %1182 = vmatmul.msk.f32.gmra.mxu2 %vm163_vm0, %v1630_v35 }
  0xfa   : > { %1118 = vmatmul.msk.f32.gmra.mxu1 %vm163_vm0, %v1630_v35 }
  0xfb   : > { %v445_v6 = vpop.f32.mrf.mxu3 }
  0xfc   : > { %v659_v9 = vpop.f32.mrf.mxu2  ;;  %911 = vst [vmem:[%s1875_s25 + $0x3c0] sm:$0xff] %v445_v6 }
  0xfd   : > { %805 = vst [vmem:[%s1875_s25 + $0x70] sm:$0xff] %v659_v9  ;;  %v340_v12 = vpop.f32.mrf.mxu0 }
  0xfe   : > { %806 = vst [vmem:[%s1875_s25 + $0x78] sm:$0xff] %v340_v12 }
  0xff   : > { %v501_v15 = vpop.f32.mrf.mxu1 }
 0x100   : > { %1143 = vmatmul.msk.f32.gmra.mxu3 %vm163_vm0, %v1470_v7  ;;  %807 = vst [vmem:[%s1875_s25 + $0x80] sm:$0xff] %v501_v15  ;;  %1055 = vmatmul.msk.f32.gmra.mxu0 %vm163_vm0, %v1613_v32 }
 0x101   : > { %1183 = vmatmul.msk.f32.gmra.mxu2 %vm163_vm0, %v1613_v32 }
 0x102   : > { %1119 = vmatmul.msk.f32.gmra.mxu1 %vm163_vm0, %v1613_v32 }
 0x103   : > { %v448_v18 = vpop.f32.mrf.mxu3 }
 0x104   : > { %v662_v21 = vpop.f32.mrf.mxu2  ;;  %914 = vst [vmem:[%s1875_s25 + $0x3d8] sm:$0xff] %v448_v18 }
 0x105   : > { %808 = vst [vmem:[%s1875_s25 + $0x88] sm:$0xff] %v662_v21  ;;  %v343_v24 = vpop.f32.mrf.mxu0 }
 0x106   : > { %809 = vst [vmem:[%s1875_s25 + $0x90] sm:$0xff] %v343_v24 }
 0x107   : > { %v504_v27 = vpop.f32.mrf.mxu1 }
 0x108   : > { %1144 = vmatmul.msk.f32.gmra.mxu3 %vm163_vm0, %v1453_v4  ;;  %810 = vst [vmem:[%s1875_s25 + $0x98] sm:$0xff] %v504_v27  ;;  %1056 = vmatmul.msk.f32.gmra.mxu0 %vm163_vm0, %v1596_v29 }
 0x109   : > { %1184 = vmatmul.msk.f32.gmra.mxu2 %vm163_vm0, %v1596_v29 }
 0x10a   : > { %1120 = vmatmul.msk.f32.gmra.mxu1 %vm163_vm0, %v1596_v29 }
 0x10b   : > { %v451_v30 = vpop.f32.mrf.mxu3 }
 0x10c   : > { %v665_v32 = vpop.f32.mrf.mxu2  ;;  %917 = vst [vmem:[%s1875_s25 + $0x3f0] sm:$0xff] %v451_v30 }
 0x10d   : > { %811 = vst [vmem:[%s1875_s25 + $0xa0] sm:$0xff] %v665_v32  ;;  %v346_v33 = vpop.f32.mrf.mxu0 }
 0x10e   : > { %812 = vst [vmem:[%s1875_s25 + $0xa8] sm:$0xff] %v346_v33 }
 0x10f   : > { %v507_v35 = vpop.f32.mrf.mxu1 }
 0x110   : > { %1145 = vmatmul.msk.f32.gmra.mxu3 %vm163_vm0, %v1440_v1  ;;  %813 = vst [vmem:[%s1875_s25 + $0xb0] sm:$0xff] %v507_v35  ;;  %1057 = vmatmul.msk.f32.gmra.mxu0 %vm163_vm0, %v1579_v26 }
 0x111   : > { %1185 = vmatmul.msk.f32.gmra.mxu2 %vm163_vm0, %v1579_v26 }
 0x112   : > { %1121 = vmatmul.msk.f32.gmra.mxu1 %vm163_vm0, %v1579_v26 }
 0x113   : > { %v454_v29 = vpop.f32.mrf.mxu3 }
 0x114   : > { %v668_v36 = vpop.f32.mrf.mxu2  ;;  %920 = vst [vmem:[%s1875_s25 + $0x408] sm:$0xff] %v454_v29 }
 0x115   : > { %814 = vst [vmem:[%s1875_s25 + $0xb8] sm:$0xff] %v668_v36  ;;  %v349_v38 = vpop.f32.mrf.mxu0 }
 0x116   : > { %815 = vst [vmem:[%s1875_s25 + $0xc0] sm:$0xff] %v349_v38 }
 0x117   : > { %v510_v39 = vpop.f32.mrf.mxu1 }
 0x118   : > { %1198 = vmatmul.msk.f32.vlgmr.msra.gmra.mxu3 %vm163_vm0, %v1623_v34  ;;  %816 = vst [vmem:[%s1875_s25 + $0xc8] sm:$0xff] %v510_v39  ;;  %1058 = vmatmul.msk.f32.gmra.mxu0 %vm163_vm0, %v1562_v23 }
 0x119   : > { %1186 = vmatmul.msk.f32.gmra.mxu2 %vm163_vm0, %v1562_v23 }
 0x11a   : > { %1122 = vmatmul.msk.f32.gmra.mxu1 %vm163_vm0, %v1562_v23 }
 0x11b   : > { %v457_v26 = vpop.f32.mrf.mxu3 }
 0x11c   : > { %v671_v41 = vpop.f32.mrf.mxu2  ;;  %923 = vst [vmem:[%s1875_s25 + $0x420] sm:$0xff] %v457_v26 }
 0x11d   : > { %817 = vst [vmem:[%s1875_s25 + $0xd0] sm:$0xff] %v671_v41  ;;  %v352_v42 = vpop.f32.mrf.mxu0 }
 0x11e   : > { %818 = vst [vmem:[%s1875_s25 + $0xd8] sm:$0xff] %v352_v42 }
 0x11f   : > { %v513_v44 = vpop.f32.mrf.mxu1 }
 0x120   : > { %1199 = vmatmul.msk.f32.gmra.mxu3 %vm163_vm0, %v1606_v31  ;;  %819 = vst [vmem:[%s1875_s25 + $0xe0] sm:$0xff] %v513_v44  ;;  %1059 = vmatmul.msk.f32.gmra.mxu0 %vm163_vm0, %v1545_v20 }
 0x121   : > { %1187 = vmatmul.msk.f32.gmra.mxu2 %vm163_vm0, %v1545_v20 }
 0x122   : > { %1123 = vmatmul.msk.f32.gmra.mxu1 %vm163_vm0, %v1545_v20 }
 0x123   : > { %v460_v23 = vpop.f32.mrf.mxu3 }
 0x124   : > { %v674_v34 = vpop.f32.mrf.mxu2  ;;  %926 = vst [vmem:[%s1875_s25 + $0x438] sm:$0xff] %v460_v23 }
 0x125   : > { %820 = vst [vmem:[%s1875_s25 + $0xe8] sm:$0xff] %v674_v34  ;;  %v355_v45 = vpop.f32.mrf.mxu0 }
 0x126   : > { %821 = vst [vmem:[%s1875_s25 + $0xf0] sm:$0xff] %v355_v45 }
 0x127   : > { %v516_v47 = vpop.f32.mrf.mxu1 }
 0x128   : > { %1200 = vmatmul.msk.f32.gmra.mxu3 %vm163_vm0, %v1589_v28  ;;  %822 = vst [vmem:[%s1875_s25 + $0xf8] sm:$0xff] %v516_v47  ;;  %1060 = vmatmul.msk.f32.gmra.mxu0 %vm163_vm0, %v1528_v17 }
 0x129   : > { %1188 = vmatmul.msk.f32.gmra.mxu2 %vm163_vm0, %v1528_v17 }
 0x12a   : > { %1124 = vmatmul.msk.f32.gmra.mxu1 %vm163_vm0, %v1528_v17 }
 0x12b   : > { %v463_v20 = vpop.f32.mrf.mxu3 }
 0x12c   : > { %v677_v31 = vpop.f32.mrf.mxu2  ;;  %929 = vst [vmem:[%s1875_s25 + $0x450] sm:$0xff] %v463_v20 }
 0x12d   : > { %823 = vst [vmem:[%s1875_s25 + $0x100] sm:$0xff] %v677_v31  ;;  %v358_v48 = vpop.f32.mrf.mxu0 }
 0x12e   : > { %824 = vst [vmem:[%s1875_s25 + $0x108] sm:$0xff] %v358_v48 }
 0x12f   : > { %v519_v49 = vpop.f32.mrf.mxu1 }
 0x130   : > { %1201 = vmatmul.msk.f32.gmra.mxu3 %vm163_vm0, %v1572_v25  ;;  %825 = vst [vmem:[%s1875_s25 + $0x110] sm:$0xff] %v519_v49  ;;  %1061 = vmatmul.msk.f32.gmra.mxu0 %vm163_vm0, %v1511_v14 }
 0x131   : > { %1189 = vmatmul.msk.f32.gmra.mxu2 %vm163_vm0, %v1511_v14 }
 0x132   : > { %1125 = vmatmul.msk.f32.gmra.mxu1 %vm163_vm0, %v1511_v14 }
 0x133   : > { %v466_v17 = vpop.f32.mrf.mxu3 }
 0x134   : > { %v680_v28 = vpop.f32.mrf.mxu2  ;;  %932 = vst [vmem:[%s1875_s25 + $0x468] sm:$0xff] %v466_v17 }
 0x135   : > { %826 = vst [vmem:[%s1875_s25 + $0x118] sm:$0xff] %v680_v28  ;;  %v361_v50 = vpop.f32.mrf.mxu0 }
 0x136   : > { %827 = vst [vmem:[%s1875_s25 + $0x120] sm:$0xff] %v361_v50 }
 0x137   : > { %v522_v51 = vpop.f32.mrf.mxu1 }
 0x138   : > { %1202 = vmatmul.msk.f32.gmra.mxu3 %vm163_vm0, %v1555_v22  ;;  %828 = vst [vmem:[%s1875_s25 + $0x128] sm:$0xff] %v522_v51  ;;  %1062 = vmatmul.msk.f32.gmra.mxu0 %vm163_vm0, %v1494_v11 }
 0x139   : > { %1190 = vmatmul.msk.f32.gmra.mxu2 %vm163_vm0, %v1494_v11 }
 0x13a   : > { %1126 = vmatmul.msk.f32.gmra.mxu1 %vm163_vm0, %v1494_v11 }
 0x13b   : > { %v594_v14 = vpop.f32.mrf.mxu3 }
 0x13c   : > { %v683_v25 = vpop.f32.mrf.mxu2  ;;  %900 = vst [vmem:[%s1875_s25 + $0x368] sm:$0xff] %v594_v14 }
 0x13d   : > { %829 = vst [vmem:[%s1875_s25 + $0x130] sm:$0xff] %v683_v25  ;;  %v364_v52 = vpop.f32.mrf.mxu0 }
 0x13e   : > { %830 = vst [vmem:[%s1875_s25 + $0x138] sm:$0xff] %v364_v52 }
 0x13f   : > { %v525_v53 = vpop.f32.mrf.mxu1 }
 0x140   : > { %1203 = vmatmul.msk.f32.gmra.mxu3 %vm163_vm0, %v1538_v19  ;;  %831 = vst [vmem:[%s1875_s25 + $0x140] sm:$0xff] %v525_v53  ;;  %1063 = vmatmul.msk.f32.gmra.mxu0 %vm163_vm0, %v1477_v8 }
 0x141   : > { %1191 = vmatmul.msk.f32.gmra.mxu2 %vm163_vm0, %v1477_v8 }
 0x142   : > { %1127 = vmatmul.msk.f32.gmra.mxu1 %vm163_vm0, %v1477_v8 }
 0x143   : > { %v597_v11 = vpop.f32.mrf.mxu3 }
 0x144   : > { %v686_v22 = vpop.f32.mrf.mxu2  ;;  %903 = vst [vmem:[%s1875_s25 + $0x380] sm:$0xff] %v597_v11 }
 0x145   : > { %832 = vst [vmem:[%s1875_s25 + $0x148] sm:$0xff] %v686_v22  ;;  %v367_v54 = vpop.f32.mrf.mxu0 }
 0x146   : > { %833 = vst [vmem:[%s1875_s25 + $0x150] sm:$0xff] %v367_v54 }
 0x147   : > { %v528_v55 = vpop.f32.mrf.mxu1 }
 0x148   : > { %1204 = vmatmul.msk.f32.gmra.mxu3 %vm163_vm0, %v1521_v16  ;;  %834 = vst [vmem:[%s1875_s25 + $0x158] sm:$0xff] %v528_v55  ;;  %1064 = vmatmul.msk.f32.gmra.mxu0 %vm163_vm0, %v1460_v5 }
 0x149   : > { %1192 = vmatmul.msk.f32.gmra.mxu2 %vm163_vm0, %v1460_v5 }
 0x14a   : > { %1128 = vmatmul.msk.f32.gmra.mxu1 %vm163_vm0, %v1460_v5 }
 0x14b   : > { %v600_v8 = vpop.f32.mrf.mxu3 }
 0x14c   : > { %v689_v19 = vpop.f32.mrf.mxu2  ;;  %906 = vst [vmem:[%s1875_s25 + $0x398] sm:$0xff] %v600_v8 }
 0x14d   : > { %835 = vst [vmem:[%s1875_s25 + $0x160] sm:$0xff] %v689_v19  ;;  %v370_v56 = vpop.f32.mrf.mxu0 }
 0x14e   : > { %836 = vst [vmem:[%s1875_s25 + $0x168] sm:$0xff] %v370_v56 }
 0x14f   : > { %v531_v57 = vpop.f32.mrf.mxu1 }
 0x150   : > { %1205 = vmatmul.msk.f32.gmra.mxu3 %vm163_vm0, %v1504_v13  ;;  %837 = vst [vmem:[%s1875_s25 + $0x170] sm:$0xff] %v531_v57  ;;  %1065 = vmatmul.msk.f32.gmra.mxu0 %vm163_vm0, %v1447_v2 }
 0x151   : > { %1193 = vmatmul.msk.f32.gmra.mxu2 %vm163_vm0, %v1447_v2 }
 0x152   : > { %1129 = vmatmul.msk.f32.gmra.mxu1 %vm163_vm0, %v1447_v2 }
 0x153   : > { %v603_v5 = vpop.f32.mrf.mxu3 }
 0x154   : > { %v692_v16 = vpop.f32.mrf.mxu2  ;;  %909 = vst [vmem:[%s1875_s25 + $0x3b0] sm:$0xff] %v603_v5 }
 0x155   : > { %838 = vst [vmem:[%s1875_s25 + $0x178] sm:$0xff] %v692_v16  ;;  %v373_v58 = vpop.f32.mrf.mxu0 }
 0x156   : > { %839 = vst [vmem:[%s1875_s25 + $0x180] sm:$0xff] %v373_v58 }
 0x157   : > { %v534_v59 = vpop.f32.mrf.mxu1 }
 0x158   : > { %1206 = vmatmul.msk.f32.gmra.mxu3 %vm163_vm0, %v1487_v10  ;;  %840 = vst [vmem:[%s1875_s25 + $0x188] sm:$0xff] %v534_v59  ;;  %1066 = vmatmul.msk.f32.gmra.mxu0 %vm163_vm0, %v1678_v46 }
 0x159   : > { %1194 = vmatmul.msk.f32.gmra.mxu2 %vm163_vm0, %v1678_v46 }
 0x15a   : > { %1130 = vmatmul.msk.f32.gmra.mxu1 %vm163_vm0, %v1678_v46 }
 0x15b   : > { %v606_v2 = vpop.f32.mrf.mxu3 }
 0x15c   : > { %v695_v13 = vpop.f32.mrf.mxu2  ;;  %912 = vst [vmem:[%s1875_s25 + $0x3c8] sm:$0xff] %v606_v2 }
 0x15d   : > { %841 = vst [vmem:[%s1875_s25 + $0x190] sm:$0xff] %v695_v13  ;;  %v376_v60 = vpop.f32.mrf.mxu0 }
 0x15e   : > { %842 = vst [vmem:[%s1875_s25 + $0x198] sm:$0xff] %v376_v60 }
 0x15f   : > { %v537_v61 = vpop.f32.mrf.mxu1 }
 0x160   : > { %1207 = vmatmul.msk.f32.gmra.mxu3 %vm163_vm0, %v1470_v7  ;;  %843 = vst [vmem:[%s1875_s25 + $0x1a0] sm:$0xff] %v537_v61  ;;  %1067 = vmatmul.msk.f32.gmra.mxu0 %vm163_vm0, %v1665_v43 }
 0x161   : > { %1195 = vmatmul.msk.f32.gmra.mxu2 %vm163_vm0, %v1665_v43 }
 0x162   : > { %1131 = vmatmul.msk.f32.gmra.mxu1 %vm163_vm0, %v1665_v43 }
 0x163   : > { %v609_v10 = vpop.f32.mrf.mxu3 }
 0x164   : > { %v698_v46 = vpop.f32.mrf.mxu2  ;;  %915 = vst [vmem:[%s1875_s25 + $0x3e0] sm:$0xff] %v609_v10 }
 0x165   : > { %844 = vst [vmem:[%s1875_s25 + $0x1a8] sm:$0xff] %v698_v46  ;;  %v379_v62 = vpop.f32.mrf.mxu0 }
 0x166   : > { %845 = vst [vmem:[%s1875_s25 + $0x1b0] sm:$0xff] %v379_v62 }
 0x167   : > { %v540_v63 = vpop.f32.mrf.mxu1 }
 0x168   : > { %1208 = vmatmul.msk.f32.gmra.mxu3 %vm163_vm0, %v1453_v4  ;;  %846 = vst [vmem:[%s1875_s25 + $0x1b8] sm:$0xff] %v540_v63  ;;  %1068 = vmatmul.msk.f32.gmra.mxu0 %vm163_vm0, %v1652_v40 }
 0x169   : > { %1196 = vmatmul.msk.f32.gmra.mxu2 %vm163_vm0, %v1652_v40 }
 0x16a   : > { %1132 = vmatmul.msk.f32.gmra.mxu1 %vm163_vm0, %v1652_v40 }
 0x16b   : > { %v612_v7 = vpop.f32.mrf.mxu3 }
 0x16c   : > { %v701_v43 = vpop.f32.mrf.mxu2  ;;  %918 = vst [vmem:[%s1875_s25 + $0x3f8] sm:$0xff] %v612_v7 }
 0x16d   : > { %847 = vst [vmem:[%s1875_s25 + $0x1c0] sm:$0xff] %v701_v43  ;;  %v382_v0 = vpop.f32.mrf.mxu0 }
 0x16e   : > { %848 = vst [vmem:[%s1875_s25 + $0x1c8] sm:$0xff] %v382_v0 }
 0x16f   : > { %v543_v3 = vpop.f32.mrf.mxu1 }
 0x170   : > { %1209 = vmatmul.msk.f32.gmra.mxu3 %vm163_vm0, %v1440_v1  ;;  %849 = vst [vmem:[%s1875_s25 + $0x1d0] sm:$0xff] %v543_v3  ;;  %1069 = vmatmul.msk.f32.gmra.mxu0 %vm163_vm0, %v1638_v37 }
 0x171   : > { %1197 = vmatmul.msk.f32.gmra.mxu2 %vm163_vm0, %v1638_v37 }
 0x172   : > { %1133 = vmatmul.msk.f32.gmra.mxu1 %vm163_vm0, %v1638_v37 }
 0x173   : > { %v615_v4 = vpop.f32.mrf.mxu3 }
 0x174   : > { %v704_v40 = vpop.f32.mrf.mxu2  ;;  %921 = vst [vmem:[%s1875_s25 + $0x410] sm:$0xff] %v615_v4 }
 0x175   : > { %850 = vst [vmem:[%s1875_s25 + $0x1d8] sm:$0xff] %v704_v40  ;;  %v385_v6 = vpop.f32.mrf.mxu0 }
 0x176   : > { %851 = vst [vmem:[%s1875_s25 + $0x1e0] sm:$0xff] %v385_v6 }
 0x177   : > { %v546_v9 = vpop.f32.mrf.mxu1 }
 0x178   : > { %852 = vst [vmem:[%s1875_s25 + $0x1e8] sm:$0xff] %v546_v9 }
 0x17b   : > { %v618_v1 = vpop.f32.mrf.mxu3 }
 0x17c   : > { %v707_v12 = vpop.f32.mrf.mxu2  ;;  %924 = vst [vmem:[%s1875_s25 + $0x428] sm:$0xff] %v618_v1 }
 0x17d   : > { %853 = vst [vmem:[%s1875_s25 + $0x1f0] sm:$0xff] %v707_v12  ;;  %v388_v37 = vpop.f32.mrf.mxu0 }
 0x17e   : > { %854 = vst [vmem:[%s1875_s25 + $0x1f8] sm:$0xff] %v388_v37 }
 0x17f   : > { %v549_v15 = vpop.f32.mrf.mxu1 }
 0x180   : > { %855 = vst [vmem:[%s1875_s25 + $0x200] sm:$0xff] %v549_v15 }
 0x183   : > { %v621_v18 = vpop.f32.mrf.mxu3 }
 0x184   : > { %v710_v21 = vpop.f32.mrf.mxu2  ;;  %927 = vst [vmem:[%s1875_s25 + $0x440] sm:$0xff] %v621_v18 }
 0x185   : > { %856 = vst [vmem:[%s1875_s25 + $0x208] sm:$0xff] %v710_v21  ;;  %v391_v24 = vpop.f32.mrf.mxu0 }
 0x186   : > { %857 = vst [vmem:[%s1875_s25 + $0x210] sm:$0xff] %v391_v24 }
 0x187   : > { %v552_v27 = vpop.f32.mrf.mxu1 }
 0x188   : > { %858 = vst [vmem:[%s1875_s25 + $0x218] sm:$0xff] %v552_v27 }
 0x18b   : > { %v624_v30 = vpop.f32.mrf.mxu3 }
 0x18c   : > { %v713_v32 = vpop.f32.mrf.mxu2  ;;  %930 = vst [vmem:[%s1875_s25 + $0x458] sm:$0xff] %v624_v30 }
 0x18d   : > { %859 = vst [vmem:[%s1875_s25 + $0x220] sm:$0xff] %v713_v32  ;;  %v394_v33 = vpop.f32.mrf.mxu0 }
 0x18e   : > { %860 = vst [vmem:[%s1875_s25 + $0x228] sm:$0xff] %v394_v33 }
 0x18f   : > { %v555_v35 = vpop.f32.mrf.mxu1 }
 0x190   : > { %861 = vst [vmem:[%s1875_s25 + $0x230] sm:$0xff] %v555_v35 }
 0x193   : > { %v627_v29 = vpop.f32.mrf.mxu3 }
 0x194   : > { %v716_v36 = vpop.f32.mrf.mxu2  ;;  %933 = vst [vmem:[%s1875_s25 + $0x470] sm:$0xff] %v627_v29 }
 0x195   : > { %862 = vst [vmem:[%s1875_s25 + $0x238] sm:$0xff] %v716_v36  ;;  %v397_v38 = vpop.f32.mrf.mxu0 }
 0x196   : > { %863 = vst [vmem:[%s1875_s25 + $0x240] sm:$0xff] %v397_v38 }
 0x197   : > { %v558_v39 = vpop.f32.mrf.mxu1 }
 0x198   : > { %864 = vst [vmem:[%s1875_s25 + $0x248] sm:$0xff] %v558_v39 }
 0x19b   : > { %v755_v41 = vpop.f32.mrf.mxu3 }
 0x19c   : > { %v719_v26 = vpop.f32.mrf.mxu2  ;;  %901 = vst [vmem:[%s1875_s25 + $0x370] sm:$0xff] %v755_v41 }
 0x19d   : > { %865 = vst [vmem:[%s1875_s25 + $0x250] sm:$0xff] %v719_v26  ;;  %v400_v42 = vpop.f32.mrf.mxu0 }
 0x19e   : > { %866 = vst [vmem:[%s1875_s25 + $0x258] sm:$0xff] %v400_v42 }
 0x19f   : > { %v561_v44 = vpop.f32.mrf.mxu1 }
 0x1a0   : > { %867 = vst [vmem:[%s1875_s25 + $0x260] sm:$0xff] %v561_v44 }
 0x1a3   : > { %v758_v34 = vpop.f32.mrf.mxu3 }
 0x1a4   : > { %v722_v23 = vpop.f32.mrf.mxu2  ;;  %904 = vst [vmem:[%s1875_s25 + $0x388] sm:$0xff] %v758_v34 }
 0x1a5   : > { %868 = vst [vmem:[%s1875_s25 + $0x268] sm:$0xff] %v722_v23  ;;  %v403_v45 = vpop.f32.mrf.mxu0 }
 0x1a6   : > { %869 = vst [vmem:[%s1875_s25 + $0x270] sm:$0xff] %v403_v45 }
 0x1a7   : > { %v564_v47 = vpop.f32.mrf.mxu1 }
 0x1a8   : > { %870 = vst [vmem:[%s1875_s25 + $0x278] sm:$0xff] %v564_v47 }
 0x1ab   : > { %v761_v31 = vpop.f32.mrf.mxu3 }
 0x1ac   : > { %v725_v20 = vpop.f32.mrf.mxu2  ;;  %907 = vst [vmem:[%s1875_s25 + $0x3a0] sm:$0xff] %v761_v31 }
 0x1ad   : > { %871 = vst [vmem:[%s1875_s25 + $0x280] sm:$0xff] %v725_v20  ;;  %v406_v48 = vpop.f32.mrf.mxu0 }
 0x1ae   : > { %872 = vst [vmem:[%s1875_s25 + $0x288] sm:$0xff] %v406_v48 }
 0x1af   : > { %v567_v49 = vpop.f32.mrf.mxu1 }
 0x1b0   : > { %873 = vst [vmem:[%s1875_s25 + $0x290] sm:$0xff] %v567_v49 }
 0x1b3   : > { %v764_v28 = vpop.f32.mrf.mxu3 }
 0x1b4   : > { %v728_v17 = vpop.f32.mrf.mxu2  ;;  %910 = vst [vmem:[%s1875_s25 + $0x3b8] sm:$0xff] %v764_v28 }
 0x1b5   : > { %874 = vst [vmem:[%s1875_s25 + $0x298] sm:$0xff] %v728_v17  ;;  %v409_v50 = vpop.f32.mrf.mxu0 }
 0x1b6   : > { %875 = vst [vmem:[%s1875_s25 + $0x2a0] sm:$0xff] %v409_v50 }
 0x1b7   : > { %v570_v51 = vpop.f32.mrf.mxu1 }
 0x1b8   : > { %876 = vst [vmem:[%s1875_s25 + $0x2a8] sm:$0xff] %v570_v51 }
 0x1bb   : > { %v767_v25 = vpop.f32.mrf.mxu3 }
 0x1bc   : > { %v731_v14 = vpop.f32.mrf.mxu2  ;;  %913 = vst [vmem:[%s1875_s25 + $0x3d0] sm:$0xff] %v767_v25 }
 0x1bd   : > { %877 = vst [vmem:[%s1875_s25 + $0x2b0] sm:$0xff] %v731_v14  ;;  %v412_v52 = vpop.f32.mrf.mxu0 }
 0x1be   : > { %878 = vst [vmem:[%s1875_s25 + $0x2b8] sm:$0xff] %v412_v52 }
 0x1bf   : > { %v573_v53 = vpop.f32.mrf.mxu1 }
 0x1c0   : > { %879 = vst [vmem:[%s1875_s25 + $0x2c0] sm:$0xff] %v573_v53 }
 0x1c3   : > { %v770_v22 = vpop.f32.mrf.mxu3 }
 0x1c4   : > { %v734_v11 = vpop.f32.mrf.mxu2  ;;  %916 = vst [vmem:[%s1875_s25 + $0x3e8] sm:$0xff] %v770_v22 }
 0x1c5   : > { %880 = vst [vmem:[%s1875_s25 + $0x2c8] sm:$0xff] %v734_v11  ;;  %v415_v54 = vpop.f32.mrf.mxu0 }
 0x1c6   : > { %881 = vst [vmem:[%s1875_s25 + $0x2d0] sm:$0xff] %v415_v54 }
 0x1c7   : > { %v576_v55 = vpop.f32.mrf.mxu1 }
 0x1c8   : > { %882 = vst [vmem:[%s1875_s25 + $0x2d8] sm:$0xff] %v576_v55 }
 0x1cb   : > { %v773_v19 = vpop.f32.mrf.mxu3 }
 0x1cc   : > { %v737_v8 = vpop.f32.mrf.mxu2  ;;  %919 = vst [vmem:[%s1875_s25 + $0x400] sm:$0xff] %v773_v19 }
 0x1cd   : > { %883 = vst [vmem:[%s1875_s25 + $0x2e0] sm:$0xff] %v737_v8  ;;  %v418_v56 = vpop.f32.mrf.mxu0 }
 0x1ce   : > { %884 = vst [vmem:[%s1875_s25 + $0x2e8] sm:$0xff] %v418_v56 }
 0x1cf   : > { %v579_v57 = vpop.f32.mrf.mxu1 }
 0x1d0   : > { %885 = vst [vmem:[%s1875_s25 + $0x2f0] sm:$0xff] %v579_v57 }
 0x1d3   : > { %v776_v16 = vpop.f32.mrf.mxu3 }
 0x1d4   : > { %v740_v5 = vpop.f32.mrf.mxu2  ;;  %922 = vst [vmem:[%s1875_s25 + $0x418] sm:$0xff] %v776_v16 }
 0x1d5   : > { %886 = vst [vmem:[%s1875_s25 + $0x2f8] sm:$0xff] %v740_v5  ;;  %v421_v58 = vpop.f32.mrf.mxu0 }
 0x1d6   : > { %887 = vst [vmem:[%s1875_s25 + $0x300] sm:$0xff] %v421_v58 }
 0x1d7   : > { %v582_v59 = vpop.f32.mrf.mxu1 }
 0x1d8   : > { %888 = vst [vmem:[%s1875_s25 + $0x308] sm:$0xff] %v582_v59 }
 0x1db   : > { %v779_v13 = vpop.f32.mrf.mxu3 }
 0x1dc   : > { %v743_v2 = vpop.f32.mrf.mxu2  ;;  %925 = vst [vmem:[%s1875_s25 + $0x430] sm:$0xff] %v779_v13 }
 0x1dd   : > { %889 = vst [vmem:[%s1875_s25 + $0x310] sm:$0xff] %v743_v2  ;;  %v424_v60 = vpop.f32.mrf.mxu0 }
 0x1de   : > { %890 = vst [vmem:[%s1875_s25 + $0x318] sm:$0xff] %v424_v60 }
 0x1df   : > { %v585_v61 = vpop.f32.mrf.mxu1 }
 0x1e0   : > { %891 = vst [vmem:[%s1875_s25 + $0x320] sm:$0xff] %v585_v61 }
 0x1e3   : > { %v782_v46 = vpop.f32.mrf.mxu3 }
 0x1e4   : > { %v746_v10 = vpop.f32.mrf.mxu2  ;;  %928 = vst [vmem:[%s1875_s25 + $0x448] sm:$0xff] %v782_v46 }
 0x1e5   : > { %892 = vst [vmem:[%s1875_s25 + $0x328] sm:$0xff] %v746_v10  ;;  %v427_v62 = vpop.f32.mrf.mxu0 }
 0x1e6   : > { %893 = vst [vmem:[%s1875_s25 + $0x330] sm:$0xff] %v427_v62 }
 0x1e7   : > { %v588_v63 = vpop.f32.mrf.mxu1 }
 0x1e8   : > { %894 = vst [vmem:[%s1875_s25 + $0x338] sm:$0xff] %v588_v63 }
 0x1eb   : > { %v785_v43 = vpop.f32.mrf.mxu3 }
 0x1ec   : > { %v749_v7 = vpop.f32.mrf.mxu2  ;;  %931 = vst [vmem:[%s1875_s25 + $0x460] sm:$0xff] %v785_v43 }
 0x1ed   : > { %895 = vst [vmem:[%s1875_s25 + $0x340] sm:$0xff] %v749_v7  ;;  %v430_v0 = vpop.f32.mrf.mxu0 }
 0x1ee   : > { %896 = vst [vmem:[%s1875_s25 + $0x348] sm:$0xff] %v430_v0 }
 0x1ef   : > { %v591_v3 = vpop.f32.mrf.mxu1 }
 0x1f0   : > { %897 = vst [vmem:[%s1875_s25 + $0x350] sm:$0xff] %v591_v3 }
 0x1f3   : > { %v788_v40 = vpop.f32.mrf.mxu3 }
 0x1f4   : > { %v752_v4 = vpop.f32.mrf.mxu2  ;;  %934 = vst [vmem:[%s1875_s25 + $0x478] sm:$0xff] %v788_v40 }
 0x1f5   : > { %898 = vst [vmem:[%s1875_s25 + $0x358] sm:$0xff] %v752_v4 }
 0x1f6   : > { %1332 = shalt.err (!%p1329_p3)
}
 0x1f7   : > { %s1369_s19 = smov 384   ;;  %s1370_s20 = smov 24  }
 0x1f8   : > { %1264 = dma.vmem_to_hbm [thread:$0]  (%p1419_p5), %s949_s30, 18432, %s951_s2, %s936_s3, %s1369_s19, %s1369_s19, %s1370_s20  }
 0x1f9 PF: > { %p1270_p4 = scmp.ge.s32.totalorder %s1367_s9, 2  ;;  %s965_s21 = sand.u32 1, %s1355_s6  }
 0x1fa   : > { %s966_s22 = scalar_lea.sflag [#allocation3], %s965_s21 }
 0x1fb   : > { %p1267_p7 = pnand %p1270_p4, %p1423_p6 }
 0x1fd   : > { %p1268_p8 = pneg %p1267_p7 }
 0x1ff   : > { %1350 = dma.done.wait (%p1268_p8), %s966_s22, 18432  }
 0x200   : > { %1352 = vsyncadd (%p1268_p8), %s966_s22, 4294948864  ;;  %p11_p9 = scmp.ge.s32.totalorder %s1406_s12, 4   ;;  %s2219_s6 = smov %s1359_s7 }
 0x201   : > { %s2220_s7 = smov %s1363_s8  ;;  %s2221_s8 = smov %s1417_s15 }
 0x202   : > { %s2222_s9 = smov %s1406_s12  ;;  %13 = sbr.rel (!%p11_p9) target bundleno = 3 (0x3), region = 59 }
 0x207   :  { %972 = vsyncpa [#allocation3], 1 }
 0x208   :  { %974 = vsyncpa [#allocation3 + $0x1], 1 }

</bundles_post_ra>
